<compile_context>
chip_gen: v5e
topology: v5e:2x2
jax: 0.10.0
libtpu: 0.0.40
codegen_flags: <defaults>
</compile_context>

<pallas_src>
import jax
import jax.numpy as jnp
from jax.experimental import pallas as pl
from jax.experimental.pallas import tpu as pltpu

_MiB = 1 << 20

# Below this byte count a fused XLA multiply beats kernel launch overhead.
DEFAULT_MIN_PALLAS_BYTES = 4 * _MiB
# Never let a single block exceed this (degenerate ultra-wide rows -> fallback).
HARD_BLOCK_CAP_BYTES = 32 * _MiB


def _cdiv(a, b):
    return -(-a // b)


def _target_block_bytes():
    # Per-generation block target: ~1/8 of physical VMEM, clamped to [2, 8] MiB.
    #   v7x (64 MiB VMEM)      -> 8 MiB blocks (~32 MiB double-buffered in-flight)
    #   v6e / v5e (128 MiB)    -> 8 MiB (cap)
    try:
        cap = int(pltpu.get_tpu_info().vmem_capacity_bytes)
        return int(min(8 * _MiB, max(2 * _MiB, cap // 8)))
    except Exception:
        return 8 * _MiB


def _scale_kernel(scale_ref, x_ref, o_ref):
    # scale_ref: (1,) f32 in SMEM. x_ref / o_ref: (bb, th, W) VMEM tiles.
    # Multiply in f32 then cast once to the output dtype (single rounding,
    # matching PyTorch's promotion). Free: this kernel is HBM-bandwidth-bound.
    o_ref[...] = (x_ref[...].astype(jnp.float32) * scale_ref[0]).astype(o_ref.dtype)


def scale_forward(x, scale_param, *,
                  min_pallas_bytes=DEFAULT_MIN_PALLAS_BYTES,
                  block_bytes=None,
                  donate_x=False):
    """y = x * scale (scalar broadcast), any float shape/dtype."""
    orig_shape = x.shape
    orig_dtype = x.dtype
    n = x.size
    itemsize = jnp.dtype(orig_dtype).itemsize

    scale_f32 = jnp.asarray(scale_param, dtype=jnp.float32)

    # XLA fast path: tiny tensors (launch + pipeline prologue costs several us
    # and a fused multiply inside a jit region costs zero extra HBM passes)
    # and scalars / 1-D vectors.
    if n == 0 or x.ndim < 2 or n * itemsize < min_pallas_bytes:
        return (x.astype(jnp.float32) * scale_f32).astype(orig_dtype)

    # Collapse leading dims only — a free reshape on TPU's (8,128)-tiled HBM
    # layout since the minor two dims are unchanged.  No (rows,128) relayout.
    H, W = orig_shape[-2], orig_shape[-1]
    B = n // (H * W)
    x3 = x.reshape(B, H, W)

    target = int(block_bytes) if block_bytes is not None else _target_block_bytes()
    target = max(target, 1)
    row_bytes = W * itemsize
    slab_bytes = H * row_bytes

    if slab_bytes <= target:
        # Tile along the collapsed leading axis; each block is `bb` full slabs.
        th = H
        bb = max(1, min(B, target // slab_bytes))
        gb = _cdiv(B, bb)
        # v7x has 2 TensorCores sharding the "parallel" axis: avoid a small,
        # odd step count (tail imbalance) by rounding the step count to even.
        if 1 < gb <= 8 and gb % 2 == 1:
            bb = max(1, _cdiv(B, gb + 1))
            gb = _cdiv(B, bb)
        gh = 1
    else:
        # One (H, W) slab exceeds the target block: keep the last dim full
        # (lane-dense) and tile the second-to-last dim in multiples of 8
        # sublanes; the trailing block may be partial (Pallas masks it).
        bb = 1
        gb = B
        th = max(8, (target // row_bytes) // 8 * 8)
        if th >= H:
            th = H
        gh = _cdiv(H, th)

    block_bytes_actual = bb * th * W * itemsize
    if block_bytes_actual > HARD_BLOCK_CAP_BYTES:
        # Degenerate case: a single (8, W) stripe is wider than the cap.
        return (x.astype(jnp.float32) * scale_f32).astype(orig_dtype)

    grid = (gb, gh)
    tile_spec = pl.BlockSpec((bb, th, W), lambda i, j: (i, j, 0))

    # In + out tiles, double-buffered, plus headroom for compiler scratch.
    vmem_limit = int(4 * block_bytes_actual + 8 * _MiB)

    scale_arr = scale_f32.reshape((1,))

    extra = {}
    if donate_x:
        # Caller guarantees x is dead: write the result into x's HBM buffer
        # (halves peak HBM footprint; traffic is unchanged).
        extra["input_output_aliases"] = {1: 0}

    y3 = pl.pallas_call(
        _scale_kernel,
        out_shape=jax.ShapeDtypeStruct((B, H, W), orig_dtype),
        grid=grid,
        in_specs=[
            pl.BlockSpec(memory_space=pltpu.SMEM),   # (1,) f32 scale parameter
            tile_spec,                                # x tile
        ],
        out_specs=tile_spec,
        compiler_params=pltpu.CompilerParams(
            dimension_semantics=("parallel", "parallel"),
            vmem_limit_bytes=vmem_limit,
        ),
        **extra,
    )(scale_arr, x3)

    return y3.reshape(orig_shape)


if __name__ == "__main__":
    key = jax.random.PRNGKey(0)
    k1, k2, k3, k4, k5 = jax.random.split(key, 5)

    # Matches nn.Parameter(torch.tensor(scale)); non-trivial value so the
    # multiply is actually exercised.
    scale = jnp.float32(0.5)

    # 1) Small NCHW input (how Scale is used in ssseg heads); force the
    #    Pallas path so the kernel itself is exercised.
    x = jax.random.normal(k1, (2, 4, 16, 16), dtype=jnp.float32)
    y = scale_forward(x, scale, min_pallas_bytes=0)
    jax.block_until_ready(y)
    assert y.shape == x.shape and y.dtype == x.dtype
    assert jnp.allclose(y, x * scale, atol=1e-6, rtol=1e-6)

    # 2) Same input through the default wrapper (small-tensor XLA fast path).
    y_fast = scale_forward(x, scale)
    assert jnp.allclose(y_fast, x * scale, atol=1e-6, rtol=1e-6)

    # 3) Multi-block grid along the collapsed leading axis (forced small block
    #    of 6 slabs -> odd step count gets rounded to an even 4-step grid,
    #    native shape, no pad / no (rows,128) relayout).
    x_b = jax.random.normal(k2, (2, 8, 96, 96), dtype=jnp.float32)
    y_b = scale_forward(x_b, scale, min_pallas_bytes=0,
                        block_bytes=6 * 96 * 96 * 4)
    assert jnp.allclose(y_b, x_b * scale, atol=1e-6, rtol=1e-6)

    # 4) Second-to-last-axis tiling path: one (H, W) slab larger than the
    #    forced block; H split in multiples of 8 with a partial trailing
    #    block, last dim (200, not 128-aligned) kept full-width.
    x_h = jax.random.normal(k3, (1, 1, 200, 200), dtype=jnp.float32)
    y_h = scale_forward(x_h, scale, min_pallas_bytes=0, block_bytes=64 * 1024)
    assert jnp.allclose(y_h, x_h * scale, atol=1e-6, rtol=1e-6)

    # 5) Fully odd sizes (nothing 8/128-aligned): single full-extent block,
    #    no padding anywhere.
    x_odd = jax.random.normal(k4, (3, 5, 7, 11), dtype=jnp.float32)
    y_odd = scale_forward(x_odd, scale, min_pallas_bytes=0)
    assert jnp.allclose(y_odd, x_odd * scale, atol=1e-6, rtol=1e-6)

    # 6) bf16 input: multiply in f32, cast once back to bf16.
    x_bf16 = jax.random.normal(k5, (2, 4, 16, 16), dtype=jnp.bfloat16)
    y_bf16 = scale_forward(x_bf16, scale, min_pallas_bytes=0)
    assert y_bf16.dtype == jnp.bfloat16
    assert jnp.allclose(y_bf16.astype(jnp.float32),
                        x_bf16.astype(jnp.float32) * 0.5,
                        atol=1e-2, rtol=1e-2)

    jax.block_until_ready((y, y_fast, y_b, y_h, y_odd, y_bf16))
    print("KERNEL_OK")
</pallas_src>

<mosaic_0001>
module attributes {stable_mosaic.version = 11 : i64} {
  func.func @_scale_kernel(%arg0: i32, %arg1: i32, %arg2: memref<1xf32, #tpu.memory_space<smem>>, %arg3: memref<8x16x16xf32, #tpu.memory_space<vmem>>, %arg4: memref<8x16x16xf32, #tpu.memory_space<vmem>>) attributes {dimension_semantics = [#tpu.dimension_semantics<parallel>, #tpu.dimension_semantics<parallel>], iteration_bounds = array<i64: 1, 1>, scalar_prefetch = 0 : i64, scratch_operands = 0 : i64, tpu.core_type = #tpu.core_type<tc>, window_params = [{transform_indices = @transform_0, window_bounds = array<i64: 1>}, {transform_indices = @transform_1, window_bounds = array<i64: 8, 16, 16>}, {transform_indices = @transform_2, window_bounds = array<i64: 8, 16, 16>}]} {
    %c0 = arith.constant 0 : index
    %c0_0 = arith.constant 0 : index
    %c0_1 = arith.constant 0 : index
    %0 = vector.load %arg3[%c0, %c0_0, %c0_1] : memref<8x16x16xf32, #tpu.memory_space<vmem>>, vector<8x16x16xf32>
    %c0_2 = arith.constant 0 : index
    %1 = memref.load %arg2[%c0_2] : memref<1xf32, #tpu.memory_space<smem>>
    %2 = vector.broadcast %1 : f32 to vector<8x16x16xf32>
    %3 = arith.mulf %0, %2 : vector<8x16x16xf32>
    %c0_3 = arith.constant 0 : index
    %c0_4 = arith.constant 0 : index
    %c0_5 = arith.constant 0 : index
    %4 = vector.load %arg4[%c0_3, %c0_4, %c0_5] : memref<8x16x16xf32, #tpu.memory_space<vmem>>, vector<8x16x16xf32>
    tpu.vector_store %arg4[%c0_3, %c0_4, %c0_5], %3 {strides = array<i32>} : memref<8x16x16xf32, #tpu.memory_space<vmem>>, vector<8x16x16xf32>,
    return
  }
  func.func @transform_0(%arg0: i32, %arg1: i32) -> i32 {
    %c0_i32 = arith.constant 0 : i32
    %c0_i32_0 = arith.constant 0 : i32
    return %c0_i32 : i32
  }
  func.func @transform_1(%arg0: i32, %arg1: i32) -> (i32, i32, i32) {
    %c0_i32 = arith.constant 0 : i32
    %c0_i32_0 = arith.constant 0 : i32
    return %arg0, %arg1, %c0_i32 : i32, i32, i32
  }
  func.func @transform_2(%arg0: i32, %arg1: i32) -> (i32, i32, i32) {
    %c0_i32 = arith.constant 0 : i32
    %c0_i32_0 = arith.constant 0 : i32
    return %arg0, %arg1, %c0_i32 : i32, i32, i32
  }
}

</mosaic_0001>

<bundles_post_ra>
// kernel: tpu_custom_call.1
= control target key start
LH: loop header
LB: loop body
LE: loop exit
PB: predicated region body
PF: predicated region fallthrough
CT: control target
= control target key end

     0   :  { %8 = vsyncpa [#allocation4], 0  ;;  %s205_s0 = inlined_call_operand.<no memory space> [shape: f32[1], index: 0, kind: input, shape index: {}]   ;;  %s206_s1 = inlined_call_operand.hbm [shape: f32[8,16,16], index: 1, kind: input, shape index: {}]   ;;  %s207_s2 = inlined_call_operand.hbm [shape: f32[8,16,16], index: 2, kind: output, shape index: {}]  }
   0x1   :  { %9 = vsyncpa [#allocation5], 0  ;;  %s16_s11 = sshll.u32 %s206_s1, 4  ;;  %s155_s12 = smov [#allocation3]   ;;  %s17_s11 = int_to_ptr.hbm [resolvable:$true] %s16_s11 }
   0x2   :  { %s18_s13 = sshll.u32 %s155_s12, 4  ;;  %s156_s14 = smov 128   ;;  %s19_s13 = int_to_ptr.vmem [resolvable:$true] %s18_s13 }
   0x3   :  { %s157_s15 = smov 8  }
   0x4   :  { %24 = dma.hbm_to_vmem [thread:$0]  %s17_s11, 2048, %s19_s13, [#allocation4], %s156_s14, %s156_s14, %s157_s15  }
   0x5   :  { %151 = dma.done.wait [#allocation4], 2048  }
   0x6   :  { %152 = vsyncadd [#allocation4], 4294965248  ;;  %v46_v0 = vstv %s205_s0  ;;  %v29_v1 = vld [vmem:[#allocation3] sm:$0xff]  ;;  %vm63_vm0 = vcmask 130048   ;;  %v30_v2 = vld [vmem:[#allocation3 + $0x8] sm:$0xff]  ;;  %s158_s0 = smov [#allocation6]  }
   0x7   :  { %v31_v3 = vld [vmem:[#allocation3 + $0x10] sm:$0xff]  ;;  %v47_v4 = vmul.f32 %v46_v0, %v29_v1  ;;  %v48_v5 = vmul.f32 %v46_v0, %v30_v2  ;;  %v32_v7 = vld [vmem:[#allocation3 + $0x18] sm:$0xff]  ;;  %v33_v8 = vld [vmem:[#allocation3 + $0x20] sm:$0xff]  ;;  %s84_s1 = sshll.u32 %s158_s0, 4  ;;  %s86_s20 = sshll.u32 %s207_s2, 4  ;;  %s85_s1 = int_to_ptr.vmem [resolvable:$true] %s84_s1  ;;  %s87_s20 = int_to_ptr.hbm [resolvable:$true] %s86_s20 }
   0x8   :  { %v49_v6 = vmul.f32 %v46_v0, %v31_v3  ;;  %v34_v9 = vld [vmem:[#allocation3 + $0x28] sm:$0xff]  ;;  %v50_v10 = vmul.f32 %v46_v0, %v32_v7  ;;  %v35_v11 = vld [vmem:[#allocation3 + $0x30] sm:$0xff]  ;;  %v51_v12 = vmul.f32 %v46_v0, %v33_v8  ;;  %v36_v13 = vld [vmem:[#allocation3 + $0x38] sm:$0xff] }
   0x9   :  { %64 = vst.msk [vmem:[#allocation6] sm:$0xff] %vm63_vm0, %v47_v4  ;;  %v52_v14 = vmul.f32 %v46_v0, %v34_v9  ;;  %v37_v15 = vld [vmem:[#allocation3 + $0x40] sm:$0xff]  ;;  %v53_v16 = vmul.f32 %v46_v0, %v35_v11  ;;  %v38_v17 = vld [vmem:[#allocation3 + $0x48] sm:$0xff]  ;;  %v54_v18 = vmul.f32 %v46_v0, %v36_v13  ;;  %v39_v19 = vld [vmem:[#allocation3 + $0x50] sm:$0xff] }
   0xa   :  { %65 = vst.msk [vmem:[#allocation6 + $0x8] sm:$0xff] %vm63_vm0, %v48_v5  ;;  %v55_v20 = vmul.f32 %v46_v0, %v37_v15  ;;  %v40_v21 = vld [vmem:[#allocation3 + $0x58] sm:$0xff]  ;;  %v56_v22 = vmul.f32 %v46_v0, %v38_v17  ;;  %v41_v23 = vld [vmem:[#allocation3 + $0x60] sm:$0xff]  ;;  %v57_v24 = vmul.f32 %v46_v0, %v39_v19  ;;  %v42_v25 = vld [vmem:[#allocation3 + $0x68] sm:$0xff] }
   0xb   :  { %66 = vst.msk [vmem:[#allocation6 + $0x10] sm:$0xff] %vm63_vm0, %v49_v6  ;;  %v58_v26 = vmul.f32 %v46_v0, %v40_v21  ;;  %v43_v27 = vld [vmem:[#allocation3 + $0x70] sm:$0xff]  ;;  %v59_v28 = vmul.f32 %v46_v0, %v41_v23  ;;  %v44_v29 = vld [vmem:[#allocation3 + $0x78] sm:$0xff]  ;;  %v60_v30 = vmul.f32 %v46_v0, %v42_v25 }
   0xc   :  { %67 = vst.msk [vmem:[#allocation6 + $0x18] sm:$0xff] %vm63_vm0, %v50_v10  ;;  %v61_v31 = vmul.f32 %v46_v0, %v43_v27  ;;  %v62_v32 = vmul.f32 %v46_v0, %v44_v29 }
   0xd   :  { %68 = vst.msk [vmem:[#allocation6 + $0x20] sm:$0xff] %vm63_vm0, %v51_v12 }
   0xe   :  { %69 = vst.msk [vmem:[#allocation6 + $0x28] sm:$0xff] %vm63_vm0, %v52_v14 }
   0xf   :  { %70 = vst.msk [vmem:[#allocation6 + $0x30] sm:$0xff] %vm63_vm0, %v53_v16 }
  0x10   :  { %71 = vst.msk [vmem:[#allocation6 + $0x38] sm:$0xff] %vm63_vm0, %v54_v18 }
  0x11   :  { %72 = vst.msk [vmem:[#allocation6 + $0x40] sm:$0xff] %vm63_vm0, %v55_v20 }
  0x12   :  { %73 = vst.msk [vmem:[#allocation6 + $0x48] sm:$0xff] %vm63_vm0, %v56_v22 }
  0x13   :  { %74 = vst.msk [vmem:[#allocation6 + $0x50] sm:$0xff] %vm63_vm0, %v57_v24 }
  0x14   :  { %75 = vst.msk [vmem:[#allocation6 + $0x58] sm:$0xff] %vm63_vm0, %v58_v26 }
  0x15   :  { %76 = vst.msk [vmem:[#allocation6 + $0x60] sm:$0xff] %vm63_vm0, %v59_v28 }
  0x16   :  { %77 = vst.msk [vmem:[#allocation6 + $0x68] sm:$0xff] %vm63_vm0, %v60_v30 }
  0x17   :  { %78 = vst.msk [vmem:[#allocation6 + $0x70] sm:$0xff] %vm63_vm0, %v61_v31 }
  0x18   :  { %79 = vst.msk [vmem:[#allocation6 + $0x78] sm:$0xff] %vm63_vm0, %v62_v32 }
  0x19   :  { %92 = dma.vmem_to_hbm [thread:$0]  %s85_s1, 2048, %s87_s20, [#allocation5], %s156_s14, %s156_s14, %s157_s15  }
  0x1a   :  { %153 = dma.done.wait [#allocation5], 2048  }
  0x1b   :  { %154 = vsyncadd [#allocation5], 4294965248 }
  0x1c   :  { %97 = vsyncpa [#allocation4], 1 }
  0x1d   :  { %98 = vsyncpa [#allocation5], 1 }

</bundles_post_ra>
